<compile_context>
chip_gen: v5e
topology: v5e:2x2
jax: 0.10.0
libtpu: 0.0.40
codegen_flags: <defaults>
</compile_context>

<pallas_src>
import math

import jax
import jax.numpy as jnp
from jax import lax
from jax.experimental import pallas as pl
from jax.experimental.pallas import tpu as pltpu


def _seq_attention_kernel(q_ref, k_ref, v_ref, o_ref, acc_ref):
    # grid = (batch, q_tiles, kv_tiles); kv is the innermost (reduction) axis.
    kv = pl.program_id(2)

    @pl.when(kv == 0)
    def _init():
        acc_ref[...] = jnp.zeros_like(acc_ref)

    # bf16 operands, f32 accumulation: native MXU rate on v5e/v6e/v7x.
    q = q_ref[0].astype(jnp.bfloat16)   # (TM, H)
    k = k_ref[0].astype(jnp.bfloat16)   # (TK, H)
    v = v_ref[0].astype(jnp.bfloat16)   # (TK, H)

    # K^T V: contract dim 0 of K with dim 0 of V (no materialized transpose).
    ktv = lax.dot_general(
        k, v, (((0,), (0,)), ((), ())),
        preferred_element_type=jnp.float32)                       # (H, H)

    # Q (K^T V): contract dim 1 of Q with dim 0 of ktv; accumulate over kv tiles.
    acc_ref[...] += lax.dot_general(
        q, ktv.astype(jnp.bfloat16), (((1,), (0,)), ((), ())),
        preferred_element_type=jnp.float32)                       # (TM, H)

    @pl.when(kv == pl.num_programs(2) - 1)
    def _finalize():
        o_ref[0] = acc_ref[...].astype(o_ref.dtype)


def _pick_tile(m):
    for t in (512, 256, 128):
        if m % t == 0:
            return t
    return m


def seq_attention(query, key, value, key_pe=None):
    """query/key/value: (B, M, H). key_pe: (1, H, M), unused by the live output path."""
    del key_pe  # dead w.r.t. the output in the reference module; dropped per perf review
    B, M, H = query.shape
    assert key.shape == (B, M, H) and value.shape == (B, M, H)

    TM = _pick_tile(M)   # query / output tile along the sequence axis
    TK = _pick_tile(M)   # key / value tile along the sequence axis
    n_q, n_kv = M // TM, M // TK

    flops = 2 * B * n_q * n_kv * (TK * H * H + TM * H * H)
    bytes_accessed = 4 * B * M * H * (n_kv + 2 * n_q + 1)  # q refetched per kv, k/v per q, + out
    cost = pl.CostEstimate(flops=flops, transcendentals=0,
                           bytes_accessed=bytes_accessed)

    return pl.pallas_call(
        _seq_attention_kernel,
        out_shape=jax.ShapeDtypeStruct((B, M, H), query.dtype),
        grid=(B, n_q, n_kv),
        in_specs=[
            pl.BlockSpec((1, TM, H), lambda b, qi, kv: (b, qi, 0)),   # Q tile
            pl.BlockSpec((1, TK, H), lambda b, qi, kv: (b, kv, 0)),   # K tile
            pl.BlockSpec((1, TK, H), lambda b, qi, kv: (b, kv, 0)),   # V tile
        ],
        out_specs=pl.BlockSpec((1, TM, H), lambda b, qi, kv: (b, qi, 0)),
        scratch_shapes=[pltpu.VMEM((TM, H), jnp.float32)],            # kv accumulator
        compiler_params=pltpu.CompilerParams(
            dimension_semantics=("parallel", "parallel", "arbitrary"),
            vmem_limit_bytes=32 * 1024 * 1024,
        ),
        cost_estimate=cost,
    )(query, key, value)


def _reference(query, key, value, key_pe, hidden_size):
    # Pure-JAX port of the PyTorch forward (f32, original association).
    attn_cont = jnp.einsum('bmd,bnd->bmn', query, key)
    attn_pos = jnp.einsum('bmd,dn->bmn', query, key_pe[0])
    attn = jax.nn.softmax((attn_cont + attn_pos) / math.sqrt(hidden_size), axis=-1)
    del attn  # dead w.r.t. the output in the PyTorch module as well (dropout is identity at eval)
    return jnp.einsum('bmn,bnd->bmd', attn_cont, value)


if __name__ == "__main__":
    B, M, H = 2, 8, 32   # batch=2, seq=8, hidden=32

    rng = jax.random.PRNGKey(0)
    kq, kk, kv, kpe = jax.random.split(rng, 4)
    query = jax.random.normal(kq, (B, M, H), dtype=jnp.float32)
    key = jax.random.normal(kk, (B, M, H), dtype=jnp.float32)
    value = jax.random.normal(kv, (B, M, H), dtype=jnp.float32)
    key_pe = jax.random.normal(kpe, (1, H, M), dtype=jnp.float32)

    out = seq_attention(query, key, value, key_pe)
    out = jax.block_until_ready(out)

    ref = _reference(query, key, value, key_pe, hidden_size=H)
    assert out.shape == (B, M, H)
    # bf16 MXU inputs + re-associated contraction => compare with a scale-aware
    # tolerance against the f32 reference (per the perf review's correctness note).
    scale = jnp.max(jnp.abs(ref)) + 1e-6
    max_err = jnp.max(jnp.abs(out.astype(jnp.float32) - ref))
    assert max_err <= 3e-2 * scale, f"mismatch vs reference: {max_err} (scale {scale})"

    print("KERNEL_OK")
</pallas_src>

<mosaic_0001>
module attributes {stable_mosaic.version = 11 : i64} {
  func.func @_seq_attention_kernel(%arg0: i32, %arg1: i32, %arg2: i32, %arg3: memref<1x8x32xf32, #tpu.memory_space<vmem>>, %arg4: memref<1x8x32xf32, #tpu.memory_space<vmem>>, %arg5: memref<1x8x32xf32, #tpu.memory_space<vmem>>, %arg6: memref<1x8x32xf32, #tpu.memory_space<vmem>>, %arg7: memref<8x32xf32, #tpu.memory_space<vmem>>) attributes {dimension_semantics = [#tpu.dimension_semantics<parallel>, #tpu.dimension_semantics<parallel>, #tpu.dimension_semantics<arbitrary>], iteration_bounds = array<i64: 2, 1, 1>, scalar_prefetch = 0 : i64, scratch_operands = 1 : i64, tpu.core_type = #tpu.core_type<tc>, window_params = [{transform_indices = @transform_0, window_bounds = array<i64: 1, 8, 32>}, {transform_indices = @transform_1, window_bounds = array<i64: 1, 8, 32>}, {transform_indices = @transform_2, window_bounds = array<i64: 1, 8, 32>}, {transform_indices = @transform_3, window_bounds = array<i64: 1, 8, 32>}]} {
    %c0_i32 = arith.constant 0 : i32
    %0 = arith.cmpi eq, %arg2, %c0_i32 : i32
    %1 = arith.extui %0 : i1 to i32
    %c0_i32_0 = arith.constant 0 : i32
    %2 = arith.cmpi ne, %1, %c0_i32_0 : i32
    scf.if %2 {
      %cst_16 = arith.constant 0.000000e+00 : f32
      %21 = vector.broadcast %cst_16 : f32 to vector<8x32xf32>
      %c0_17 = arith.constant 0 : index
      %c0_18 = arith.constant 0 : index
      %22 = vector.load %arg7[%c0_17, %c0_18] : memref<8x32xf32, #tpu.memory_space<vmem>>, vector<8x32xf32>
      tpu.vector_store %arg7[%c0_17, %c0_18], %21 {strides = array<i32>} : memref<8x32xf32, #tpu.memory_space<vmem>>, vector<8x32xf32>,
    } else {
    }
    %c0 = arith.constant 0 : index
    %c0_1 = arith.constant 0 : index
    %c0_2 = arith.constant 0 : index
    %3 = vector.load %arg3[%c0, %c0_1, %c0_2] : memref<1x8x32xf32, #tpu.memory_space<vmem>>, vector<1x8x32xf32>
    %4 = vector.shape_cast %3 : vector<1x8x32xf32> to vector<8x32xf32>
    %5 = arith.truncf %4 : vector<8x32xf32> to vector<8x32xbf16>
    %c0_3 = arith.constant 0 : index
    %c0_4 = arith.constant 0 : index
    %c0_5 = arith.constant 0 : index
    %6 = vector.load %arg4[%c0_3, %c0_4, %c0_5] : memref<1x8x32xf32, #tpu.memory_space<vmem>>, vector<1x8x32xf32>
    %7 = vector.shape_cast %6 : vector<1x8x32xf32> to vector<8x32xf32>
    %8 = arith.truncf %7 : vector<8x32xf32> to vector<8x32xbf16>
    %c0_6 = arith.constant 0 : index
    %c0_7 = arith.constant 0 : index
    %c0_8 = arith.constant 0 : index
    %9 = vector.load %arg5[%c0_6, %c0_7, %c0_8] : memref<1x8x32xf32, #tpu.memory_space<vmem>>, vector<1x8x32xf32>
    %10 = vector.shape_cast %9 : vector<1x8x32xf32> to vector<8x32xf32>
    %11 = arith.truncf %10 : vector<8x32xf32> to vector<8x32xbf16>
    %cst = arith.constant dense<0.000000e+00> : vector<32x32xf32>
    %12 = tpu.matmul %8, %11, %cst {dimension_numbers = #tpu.dot_dimension_numbers<[0], [0], [1], [1], [0, 1, 1, 1], [], []>} : vector<8x32xbf16>, vector<8x32xbf16>, vector<32x32xf32> -> vector<32x32xf32>
    %c0_9 = arith.constant 0 : index
    %c0_10 = arith.constant 0 : index
    %13 = vector.load %arg7[%c0_9, %c0_10] : memref<8x32xf32, #tpu.memory_space<vmem>>, vector<8x32xf32>
    %14 = arith.truncf %12 : vector<32x32xf32> to vector<32x32xbf16>
    %cst_11 = arith.constant dense<0.000000e+00> : vector<8x32xf32>
    %15 = tpu.matmul %5, %14, %cst_11 {dimension_numbers = #tpu.dot_dimension_numbers<[1], [0], [0], [1], [0, 0, 1, 1], [], []>} : vector<8x32xbf16>, vector<32x32xbf16>, vector<8x32xf32> -> vector<8x32xf32>
    %16 = arith.addf %13, %15 : vector<8x32xf32>
    %c0_12 = arith.constant 0 : index
    %c0_13 = arith.constant 0 : index
    %17 = vector.load %arg7[%c0_12, %c0_13] : memref<8x32xf32, #tpu.memory_space<vmem>>, vector<8x32xf32>
    tpu.vector_store %arg7[%c0_12, %c0_13], %16 {strides = array<i32>} : memref<8x32xf32, #tpu.memory_space<vmem>>, vector<8x32xf32>,
    %c0_i32_14 = arith.constant 0 : i32
    %18 = arith.cmpi eq, %arg2, %c0_i32_14 : i32
    %19 = arith.extui %18 : i1 to i32
    %c0_i32_15 = arith.constant 0 : i32
    %20 = arith.cmpi ne, %19, %c0_i32_15 : i32
    scf.if %20 {
      %c0_16 = arith.constant 0 : index
      %c0_17 = arith.constant 0 : index
      %21 = vector.load %arg7[%c0_16, %c0_17] : memref<8x32xf32, #tpu.memory_space<vmem>>, vector<8x32xf32>
      %c0_18 = arith.constant 0 : index
      %c0_19 = arith.constant 0 : index
      %c0_20 = arith.constant 0 : index
      %22 = vector.load %arg6[%c0_18, %c0_19, %c0_20] : memref<1x8x32xf32, #tpu.memory_space<vmem>>, vector<1x8x32xf32>
      %23 = vector.shape_cast %22 : vector<1x8x32xf32> to vector<8x32xf32>
      %24 = vector.shape_cast %21 : vector<8x32xf32> to vector<1x8x32xf32>
      tpu.vector_store %arg6[%c0_18, %c0_19, %c0_20], %24 {strides = array<i32>} : memref<1x8x32xf32, #tpu.memory_space<vmem>>, vector<1x8x32xf32>,
    } else {
    }
    return
  }
  func.func @transform_0(%arg0: i32, %arg1: i32, %arg2: i32) -> (i32, i32, i32) {
    %c0_i32 = arith.constant 0 : i32
    %c0_i32_0 = arith.constant 0 : i32
    return %arg0, %arg1, %c0_i32 : i32, i32, i32
  }
  func.func @transform_1(%arg0: i32, %arg1: i32, %arg2: i32) -> (i32, i32, i32) {
    %c0_i32 = arith.constant 0 : i32
    %c0_i32_0 = arith.constant 0 : i32
    return %arg0, %arg2, %c0_i32 : i32, i32, i32
  }
  func.func @transform_2(%arg0: i32, %arg1: i32, %arg2: i32) -> (i32, i32, i32) {
    %c0_i32 = arith.constant 0 : i32
    %c0_i32_0 = arith.constant 0 : i32
    return %arg0, %arg2, %c0_i32 : i32, i32, i32
  }
  func.func @transform_3(%arg0: i32, %arg1: i32, %arg2: i32) -> (i32, i32, i32) {
    %c0_i32 = arith.constant 0 : i32
    %c0_i32_0 = arith.constant 0 : i32
    return %arg0, %arg1, %c0_i32 : i32, i32, i32
  }
}

</mosaic_0001>

<bundles_post_ra>
// kernel: tpu_custom_call.1
= control target key start
LH: loop header
LB: loop body
LE: loop exit
PB: predicated region body
PF: predicated region fallthrough
CT: control target
= control target key end

     0   :  { %s984_s0 = inlined_call_operand.hbm [shape: f32[2,8,32], index: 0, kind: input, shape index: {}]   ;;  %s985_s1 = inlined_call_operand.hbm [shape: f32[2,8,32], index: 1, kind: input, shape index: {}]   ;;  %s986_s2 = inlined_call_operand.hbm [shape: f32[2,8,32], index: 2, kind: input, shape index: {}]   ;;  %s987_s3 = inlined_call_operand.hbm [shape: f32[2,8,32], index: 3, kind: output, shape index: {}]  }
   0x1   :  { %990 = sst [smem:[#allocation16_spill]] %s985_s1 }
   0x2   :  { %8 = vsyncpa [#allocation4], 0 }
   0x3   :  { %10 = vsyncpa [#allocation4 + $0x1], 0 }
   0x4   :  { %11 = vsyncpa [#allocation7], 0 }
   0x5   :  { %13 = vsyncpa [#allocation7 + $0x1], 0 }
   0x6   :  { %14 = vsyncpa [#allocation5], 0 }
   0x7   :  { %16 = vsyncpa [#allocation5 + $0x1], 0  ;;  %s820_s12 = smov 0   ;;  %s822_s13 = smov 0  }
   0x8   :  { %s824_s14 = smov 0   ;;  %s826_s15 = smov 0  }
   0x9   :  { %s828_s16 = smov 0   ;;  %s830_s17 = smov 0  }
   0xa LB: > { %991 = sst [smem:[#allocation13_spill]] %s793_s16  ;;  %s851_s18 = sadd.s32 4294967295, %s797_s17   ;;  %s797_s17 = sphi %s830_s17, %s22_s17   ;;  %s793_s16 = sphi %s828_s16, %s1003_s16   ;;  %s789_s15 = sphi %s826_s15, %s1002_s15   ;;  %s785_s14 = sphi %s824_s14, %s1006_s14   ;;  %s781_s13 = sphi %s822_s13, %s1005_s13   ;;  %s777_s12 = sphi %s820_s12, %s1004_s12  }
   0xb   : > { %s525_s19 = sadd.s32 4294967294, %s797_s17   ;;  %s41_s20 = sadd.s32 1, %s793_s16 }
   0xc   : > { %s50_s21 = sadd.s32 1, %s785_s14  ;;  %p43_p0 = scmp.ge.s32.totalorder %s41_s20, 2 }
   0xd   : > { %p57_p1 = scmp.ne.s32.totalorder %s785_s14, %s781_s13  ;;  %p58_p2 = scmp.eq.s32.totalorder %s797_s17, 0 }
   0xe   : > { %p63_p3 = scmp.ne.s32.totalorder %s781_s13, %s777_s12  ;;  %s1008_s20 = smov (%p43_p0, %s41_s20), 0 }
   0xf   : > { %992 = sst [smem:[#allocation14_spill]] %s1008_s20  ;;  %p863_p4 = por %p58_p2, %p57_p1 }
  0x10   : > { %p64_p5 = scmp.eq.s32.totalorder %s851_s18, 0  ;;  %s45_s23 = ssub.s32 %s793_s16, %s1008_s20 }
  0x11   : > { %p145_p6 = scmp.eq.s32.totalorder %s851_s18, 1  ;;  %p48_p7 = scmp.eq.s32.totalorder %s45_s23, 0 }
  0x12   : > { %p871_p8 = por %p64_p5, %p63_p3  ;;  %p151_p10 = scmp.eq.s32.totalorder %s525_s19, 1 }
  0x13   : > { %p875_p9 = por %p145_p6, %p57_p1  ;;  %p527_p12 = scmp.ge.s32.totalorder %s797_s17, 2 }
  0x14   : > { %s880_s26 = scalar_select %p48_p7, %s785_s14, %s50_s21  }
  0x15   : > { %p882_p11 = por %p151_p10, %p63_p3  ;;  %p569_p13 = scmp.lt.s32.totalorder %s797_s17, 2 }
  0x16   : > { %996 = sst [smem:[#allocation15_spill]] %s880_s26  ;;  %s171_s28 = sand.u32 1, %s785_s14  }
  0x17   : > { %s528_s29 = sshll.u32 %s171_s28, 3  ;;  %s529_s30 = sshll.u32 %s793_s16, 3 }
  0x18   : > { %p892_p0 = pnand %p569_p13, %p863_p4  ;;  %s191_s5 = sand.u32 1, %s797_s17  }
  0x19   : > { %s999_s1 = sld [smem:[#allocation16_spill]]  ;;  %s195_s10 = scalar_lea.vmem [#allocation6], %s528_s29 }
  0x1a   : > { %s204_s11 = sshll.u32 %s195_s10, 4  ;;  %s192_s19 = scalar_lea.sflag [#allocation7], %s191_s5  ;;  %s205_s11 = int_to_ptr.vmem [resolvable:$true] %s204_s11 }
  0x1b   : > { %p534_p1 = scmp.ge.s32.totalorder %s797_s17, 1  ;;  %p229_p2 = scmp.lt.s32.totalorder %s797_s17, 3 }
  0x1c   : > { %s180_s6 = scalar_lea.hbm %s984_s0, %s529_s30  ;;  %s172_s10 = scalar_lea.sflag [#allocation4], %s171_s28 }
  0x1d   : > { %p904_p3 = pnand %p534_p1, %p229_p2  ;;  %s182_s7 = sshll.u32 %s180_s6, 4  ;;  %s183_s7 = int_to_ptr.hbm [resolvable:$true] %s182_s7 }
  0x1e   : > { %s215_s16 = scalar_lea.vmem [#allocation8], %s528_s29  ;;  %s921_s22 = sand.u32 (!%p904_p3), 1, %s781_s13  }
  0x1f   : > { %s200_s8 = scalar_lea.hbm %s999_s1, %s529_s30  ;;  %s224_s26 = sshll.u32 %s215_s16, 4  ;;  %s225_s26 = int_to_ptr.vmem [resolvable:$true] %s224_s26 }
  0x20   : > { %s202_s9 = sshll.u32 %s200_s8, 4  ;;  %s175_s8 = scalar_lea.vmem [#allocation3], %s528_s29  ;;  %s203_s9 = int_to_ptr.hbm [resolvable:$true] %s202_s9 }
  0x21   : > { %561 = dma.hbm_to_vmem [thread:$0]  (!%p892_p0), %s203_s9, 128, %s205_s11, %s192_s19  }
  0x22   : > { %s184_s1 = sshll.u32 %s175_s8, 4  ;;  %s220_s11 = scalar_lea.hbm %s986_s2, %s529_s30  ;;  %s185_s1 = int_to_ptr.vmem [resolvable:$true] %s184_s1 }
  0x23   : > { %558 = dma.hbm_to_vmem [thread:$0]  (!%p892_p0), %s183_s7, 128, %s185_s1, %s172_s10  }
  0x24   : > { %s222_s20 = sshll.u32 %s220_s11, 4  ;;  %233 = sbr.rel (%p904_p3) target bundleno = 525 (0x20d), region = 32  ;;  %s223_s20 = int_to_ptr.hbm [resolvable:$true] %s222_s20 }
  0x25   : > { %564 = dma.hbm_to_vmem [thread:$0]  (!%p892_p0), %s223_s20, 128, %s225_s26, %s192_s19  }
  0x26   : > { %s924_s1 = sshll.u32 (!%p904_p3), %s921_s22, 3  ;;  %s236_s28 = scalar_lea.sflag (!%p904_p3), [#allocation4], %s921_s22 }
  0x27   : > { %s239_s30 = scalar_lea.vmem (!%p904_p3), [#allocation3], %s924_s1 }
  0x29   : > { %764 = dma.done.wait (%p871_p8), %s236_s28, 128  }
  0x2a   : > { %766 = vsyncadd (%p871_p8), %s236_s28, 4294967168  ;;  %s245_s16 = sand.u32 1, %s851_s18   ;;  %s249_s26 = scalar_lea.vmem [#allocation6], %s924_s1 }
  0x2b   : > { %s246_s20 = scalar_lea.sflag [#allocation7], %s245_s16 }
  0x2c   : > { %768 = dma.done.wait (%p871_p8), %s246_s20, 256  }
  0x2d   : > { %770 = vsyncadd (%p871_p8), %s246_s20, 4294967040  ;;  %v302_v0 = vld [vmem:[%s249_s26] sm:$0xff]  ;;  %s259_s29 = scalar_lea.vmem [#allocation8], %s924_s1  ;;  %vm329_vm0 = vcmask 1043456   ;;  %vm322_vm1 = vcmask 64512   ;;  %vm298_vm2 = vcmask 261120  }
  0x2e   : > { %v304_v1 = vld [vmem:[%s259_s29] sm:$0xff]  ;;  %v303_v2 = vpack.c.bf16 %v302_v0, %v302_v0  ;;  %v799_v7 = vmov 0.0   ;;  %s543_s18 = sshll.u32 %s789_s15, 3  ;;  %s292_s21 = scalar_lea.vmem [#allocation9], %s924_s1 }
  0x2f   : > { %v305_v3 = vpack.c.bf16 %v304_v1, %v304_v1  ;;  %299 = vst.msk [vmem:[#allocation2] sm:$0xff] %vm298_vm2, %v799_v7  ;;  %v300_v13 = vld [vmem:[%s239_s30] sm:$0xff]  ;;  %s391_s19 = scalar_lea.hbm %s987_s3, %s543_s18  ;;  %s393_s23 = sshll.u32 %s292_s21, 4  ;;  %s394_s23 = int_to_ptr.vmem [resolvable:$true] %s393_s23 }
  0x30   : > { %306 = vxpose.xlu0.c.b16.start.end [1/1] (short) (narrow) %v303_v2, 32  ;;  %v301_v15 = vpack.c.bf16 %v300_v13, %v300_v13  ;;  %s395_s6 = sshll.u32 %s391_s19, 4  ;;  %s380_s7 = scalar_lea.sflag [#allocation5], %s921_s22  ;;  %s396_s6 = int_to_ptr.hbm [resolvable:$true] %s395_s6 }
  0x31   : > { %v331_v4 = vsel %vm329_vm0, %v305_v3, 0  ;;  %s725_s8 = sshra.s32 %s396_s6, 4  ;;  %s731_s9 = scalar_lea.hbm %s987_s3, 16  ;;  %s726_s8 = int_to_ptr.hbm [resolvable:$true] %s725_s8 }
  0x32   : > { %340 = vmatpush.bf16.msra.mxu0 %v331_v4  ;;  %546 = vmatpush.bf16.msra.mxu2 %v331_v4  ;;  %s727_s15 = scalar_lea.hbm %s726_s8, 8  ;;  %p732_p7 = scmp.lt.s32.totalorder %s726_s8, %s987_s3 }
  0x33   : > { %p728_p4 = scmp.ne.s32.totalorder %s726_s8, %s727_s15  ;;  %p733_p8 = scmp.lt.s32.totalorder %s731_s9, %s727_s15 }
  0x35   : > { %p729_p5 = pnand %p728_p4, %p875_p9  ;;  %p734_p10 = por %p733_p8, %p732_p7 }
  0x36   : > { %v352_v16 = vld [vmem:[#allocation2] sm:$0xff] }
  0x37   : > { %p730_p6 = pneg %p729_p5 }
  0x39   : > { %p735_p13 = pnand %p734_p10, %p730_p6 }
  0xdc   : > { %v314_v5 = vpop.trf.xlu0 }
  0xdd   : > { %539 = vmatmul.msk.bf16.vlgmr.msra.gmra.mxu0 %vm322_vm1, %v314_v5 }
  0xec   : > { %v315_v6 = vpop.trf.xlu0 }
  0xed   : > { %540 = vmatmul.msk.bf16.vlgmr.msra.gmra.mxu2 %vm322_vm1, %v315_v6 }
 0x15a   : > { %v342_v8 = vpop.f32.mrf.mxu0 }
 0x162   : > { %v344_v12 = vpop.f32.mrf.mxu0 }
 0x163   : > { %v353_v14 = vpack.c.bf16 %v344_v12, %v342_v8 }
 0x170   : > { %v347_v9 = vpop.f32.mrf.mxu2 }
 0x178   : > { %v349_v10 = vpop.f32.mrf.mxu2 }
 0x179   : > { %v354_v11 = vpack.c.bf16 %v349_v10, %v347_v9 }
 0x17b   : > { %365 = vmatpush.bf16.msra.mxu1 %v354_v11 }
 0x17f   : > { %366 = vmatpush.bf16.msra.mxu1 %v353_v14 }
 0x182   : > { %541 = vmatmul.msk.bf16.vlgmr.msra.gmra.mxu1 %vm298_vm2, %v301_v15 }
 0x1ff   : > { %v368_v17 = vpop.f32.mrf.mxu1 }
 0x200   : > { %v372_v18 = vadd.f32 %v368_v17, %v352_v16 }
 0x202   : > { %373 = vst.msk [vmem:[#allocation2] sm:$0xff] %vm298_vm2, %v372_v18 }
 0x207   : > { %v370_v19 = vpop.f32.mrf.mxu1 }
 0x209   : > { %v377_v20 = vld [vmem:[#allocation2] sm:$0xff] }
 0x20a   : > { %378 = vst.msk [vmem:[%s292_s21] sm:$0xff] %vm298_vm2, %v377_v20 }
 0x20b   : > { %738 = shalt.err (!%p735_p13)
}
 0x20c   : > { %553 = dma.vmem_to_hbm [thread:$0]  (%p875_p9), %s394_s23, 128, %s396_s6, %s380_s7  }
 0x20d PF: > { %s407_s22 = sand.u32 1, %s777_s12   ;;  %p566_p0 = pnand %p527_p12, %p882_p11 }
 0x20e   : > { %s408_s28 = scalar_lea.sflag [#allocation5], %s407_s22 }
 0x20f   : > { %p567_p1 = pneg %p566_p0 }
 0x211   : > { %772 = dma.done.wait (%p567_p1), %s408_s28, 128  }
 0x212   : > { %774 = vsyncadd (%p567_p1), %s408_s28, 4294967168  ;;  %s22_s17 = sadd.s32 1, %s797_s17   ;;  %s1001_s30 = sld [smem:[#allocation15_spill]] }
 0x213   : > { %p19_p2 = scmp.ge.s32.totalorder %s22_s17, 4   ;;  %s1002_s15 = sld [smem:[#allocation13_spill]] }
 0x214   : > { %s1003_s16 = sld [smem:[#allocation14_spill]]  ;;  %s1004_s12 = smov %s781_s13 }
 0x215   : > { %s1005_s13 = smov %s785_s14  ;;  %21 = sbr.rel (!%p19_p2) target bundleno = 10 (0xa), region = 109 }
 0x218   : > { %s1006_s14 = smov %s1001_s30 }
 0x21a   :  { %414 = vsyncpa [#allocation4], 1 }
 0x21b   :  { %416 = vsyncpa [#allocation4 + $0x1], 1 }
 0x21c   :  { %417 = vsyncpa [#allocation7], 1 }
 0x21d   :  { %419 = vsyncpa [#allocation7 + $0x1], 1 }
 0x21e   :  { %420 = vsyncpa [#allocation5], 1 }
 0x21f   :  { %422 = vsyncpa [#allocation5 + $0x1], 1 }

</bundles_post_ra>
